<compile_context>
chip_gen: v5e
topology: v5e:2x2
jax: 0.10.0
libtpu: 0.0.40
codegen_flags: <defaults>
</compile_context>

<pallas_src>
import math
import functools

import jax
import jax.numpy as jnp
from jax.experimental import pallas as pl
from jax.experimental.pallas import tpu as pltpu


def _round_up(n, m):
    return ((n + m - 1) // m) * m


def gcn_kernel(a_ref, y_ref, r_ref, o_ref):
    k = pl.program_id(1)

    # (TM, TK) @ (TK, Fp) -> f32, lane-dense (Fp is a multiple of 128).
    contrib = jnp.dot(a_ref[...], y_ref[...], preferred_element_type=jnp.float32)

    @pl.when(k == 0)
    def _():
        o_ref[...] = r_ref[...] + contrib

    @pl.when(k > 0)
    def _():
        o_ref[...] += contrib


@functools.partial(jax.jit, static_argnames=("tm", "tk"))
def gcn_forward(a_norm, y, r, *, tm, tk):
    n_pad = a_norm.shape[0]
    f_pad = y.shape[1]
    grid = (n_pad // tm, n_pad // tk)

    cost = pl.CostEstimate(
        flops=2 * n_pad * n_pad * f_pad,
        transcendentals=0,
        bytes_accessed=(2 * n_pad * n_pad                      # A (bf16)
                        + 2 * n_pad * f_pad * (n_pad // tm)    # Y re-fetched per row tile
                        + 4 * n_pad * f_pad                    # R
                        + 4 * n_pad * f_pad),                  # out
    )

    return pl.pallas_call(
        gcn_kernel,
        out_shape=jax.ShapeDtypeStruct((n_pad, f_pad), jnp.float32),
        grid=grid,
        in_specs=[
            pl.BlockSpec((tm, tk), lambda i, k: (i, k)),       # A_norm tile (bf16)
            pl.BlockSpec((tk, f_pad), lambda i, k: (k, 0)),    # Y = x @ W   (bf16)
            pl.BlockSpec((tm, f_pad), lambda i, k: (i, 0)),    # R = x @ Wr + b (f32)
        ],
        out_specs=pl.BlockSpec((tm, f_pad), lambda i, k: (i, 0)),
        compiler_params=pltpu.CompilerParams(
            dimension_semantics=("parallel", "arbitrary")),
        cost_estimate=cost,
    )(a_norm, y, r)


def gcn(x, edge_index, weight, root_weight, bias, *, max_tile=1024):
    """Wrapper matching GCN.forward semantics (eval mode, dropout = identity).

    max_tile must be a multiple of 128.
    """
    n, d = x.shape
    f = weight.shape[1]

    # ---- padding / tile selection: N -> mult of 128 only, tile divides n_pad ----
    n_pad = _round_up(n, 128)
    f_pad = _round_up(f, 128)
    tile = 128
    for cand in range(min(max_tile, n_pad), 127, -128):
        if n_pad % cand == 0:
            tile = cand
            break
    tm = tk = tile

    # ---- dense, row-normalised adjacency built directly at padded size ----
    adj = jnp.zeros((n_pad, n_pad), jnp.float32)
    if edge_index.size > 0:
        row, col = edge_index[0], edge_index[1]
        adj = adj.at[row, col].add(1.0)
    deg = jnp.clip(jnp.sum(adj, axis=1, keepdims=True), 1.0)
    a_norm = (adj / deg).astype(jnp.bfloat16)           # fold 1/deg into A, halve bytes

    # ---- tiny pre-matmuls in the wrapper (lane-dense RHS for the kernel) ----
    x_p = jnp.zeros((n_pad, d), jnp.float32).at[:n, :].set(x)
    y = x_p @ weight                                     # (n_pad, f) f32
    y_p = jnp.zeros((n_pad, f_pad), jnp.bfloat16).at[:, :f].set(y.astype(jnp.bfloat16))
    r = x_p @ root_weight + bias                         # (n_pad, f) f32
    r_p = jnp.zeros((n_pad, f_pad), jnp.float32).at[:, :f].set(r)

    out = gcn_forward(a_norm, y_p, r_p, tm=tm, tk=tk)
    return out[:n, :f]


if __name__ == "__main__":
    node_dim, out_dim = 8, 32

    key = jax.random.PRNGKey(0)
    k_x, k_e, k_w, k_rw, k_b = jax.random.split(key, 5)

    # Deterministic parameter init matching reset_parameters(): U(-stdv, stdv).
    stdv = 1.0 / math.sqrt(node_dim)
    weight = jax.random.uniform(k_w, (node_dim, out_dim), jnp.float32, -stdv, stdv)
    root_weight = jax.random.uniform(k_rw, (node_dim, out_dim), jnp.float32, -stdv, stdv)
    bias = jax.random.uniform(k_b, (out_dim,), jnp.float32, -stdv, stdv)

    def reference(x, edge_index):
        n = x.shape[0]
        if edge_index.size == 0:
            return x @ root_weight + bias
        row, col = edge_index[0], edge_index[1]
        msg = (x @ weight)[col]
        agg = jnp.zeros((n, out_dim), jnp.float32).at[row].add(msg)
        deg = jnp.zeros((n,), jnp.float32).at[row].add(1.0)
        return agg / jnp.clip(deg, 1.0)[:, None] + x @ root_weight + bias

    # Small molecular-sized graph (single tile, single grid step).
    N, E = 16, 24
    x = jax.random.normal(k_x, (N, node_dim), jnp.float32)
    edge_index = jax.random.randint(k_e, (2, E), 0, N, jnp.int32)
    out = gcn(x, edge_index, weight, root_weight, bias)
    jax.block_until_ready(out)
    assert jnp.allclose(out, reference(x, edge_index), atol=2e-2, rtol=2e-2), \
        "mismatch vs reference (small graph)"

    # Larger graph with a small tile -> exercises the (row, K) grid + resident accumulate.
    N2, E2 = 300, 900
    k_x2, k_e2 = jax.random.split(k_x)
    x2 = jax.random.normal(k_x2, (N2, node_dim), jnp.float32)
    edge_index2 = jax.random.randint(k_e2, (2, E2), 0, N2, jnp.int32)
    out2 = gcn(x2, edge_index2, weight, root_weight, bias, max_tile=128)
    jax.block_until_ready(out2)
    assert jnp.allclose(out2, reference(x2, edge_index2), atol=2e-2, rtol=2e-2), \
        "mismatch vs reference (tiled graph)"

    # Same graph with default tiling (single 384-wide tile).
    out2b = gcn(x2, edge_index2, weight, root_weight, bias)
    jax.block_until_ready(out2b)
    assert jnp.allclose(out2b, reference(x2, edge_index2), atol=2e-2, rtol=2e-2), \
        "mismatch vs reference (default tile)"

    # Empty-edge branch check (aggregation term vanishes exactly, f32 path).
    out_empty = gcn(x, jnp.zeros((2, 0), jnp.int32), weight, root_weight, bias)
    jax.block_until_ready(out_empty)
    assert jnp.allclose(out_empty, x @ root_weight + bias, atol=1e-5, rtol=1e-5), \
        "mismatch vs reference (empty edges)"

    print("KERNEL_OK")
</pallas_src>

<mosaic_0001>
module attributes {stable_mosaic.version = 11 : i64} {
  func.func @gcn_kernel(%arg0: i32, %arg1: i32, %arg2: memref<128x128xbf16, #tpu.memory_space<vmem>>, %arg3: memref<128x128xbf16, #tpu.memory_space<vmem>>, %arg4: memref<128x128xf32, #tpu.memory_space<vmem>>, %arg5: memref<128x128xf32, #tpu.memory_space<vmem>>) attributes {dimension_semantics = [#tpu.dimension_semantics<parallel>, #tpu.dimension_semantics<arbitrary>], iteration_bounds = array<i64: 1, 1>, scalar_prefetch = 0 : i64, scratch_operands = 0 : i64, tpu.core_type = #tpu.core_type<tc>, window_params = [{transform_indices = @transform_0, window_bounds = array<i64: 128, 128>}, {transform_indices = @transform_1, window_bounds = array<i64: 128, 128>}, {transform_indices = @transform_2, window_bounds = array<i64: 128, 128>}, {transform_indices = @transform_3, window_bounds = array<i64: 128, 128>}]} {
    %c0 = arith.constant 0 : index
    %c0_0 = arith.constant 0 : index
    %0 = vector.load %arg2[%c0, %c0_0] : memref<128x128xbf16, #tpu.memory_space<vmem>>, vector<128x128xbf16>
    %c0_1 = arith.constant 0 : index
    %c0_2 = arith.constant 0 : index
    %1 = vector.load %arg3[%c0_1, %c0_2] : memref<128x128xbf16, #tpu.memory_space<vmem>>, vector<128x128xbf16>
    %cst = arith.constant dense<0.000000e+00> : vector<128x128xf32>
    %2 = tpu.matmul %0, %1, %cst {dimension_numbers = #tpu.dot_dimension_numbers<[1], [0], [0], [1], [0, 0, 1, 1], [], []>} : vector<128x128xbf16>, vector<128x128xbf16>, vector<128x128xf32> -> vector<128x128xf32>
    %c0_i32 = arith.constant 0 : i32
    %3 = arith.cmpi eq, %arg1, %c0_i32 : i32
    %4 = arith.extui %3 : i1 to i32
    %c0_i32_3 = arith.constant 0 : i32
    %5 = arith.cmpi ne, %4, %c0_i32_3 : i32
    scf.if %5 {
      %c0_6 = arith.constant 0 : index
      %c0_7 = arith.constant 0 : index
      %9 = vector.load %arg4[%c0_6, %c0_7] : memref<128x128xf32, #tpu.memory_space<vmem>>, vector<128x128xf32>
      %10 = arith.addf %9, %2 : vector<128x128xf32>
      %c0_8 = arith.constant 0 : index
      %c0_9 = arith.constant 0 : index
      %11 = vector.load %arg5[%c0_8, %c0_9] : memref<128x128xf32, #tpu.memory_space<vmem>>, vector<128x128xf32>
      tpu.vector_store %arg5[%c0_8, %c0_9], %10 {strides = array<i32>} : memref<128x128xf32, #tpu.memory_space<vmem>>, vector<128x128xf32>,
    } else {
    }
    %c0_i32_4 = arith.constant 0 : i32
    %6 = arith.cmpi sgt, %arg1, %c0_i32_4 : i32
    %7 = arith.extui %6 : i1 to i32
    %c0_i32_5 = arith.constant 0 : i32
    %8 = arith.cmpi ne, %7, %c0_i32_5 : i32
    scf.if %8 {
      %c0_6 = arith.constant 0 : index
      %c0_7 = arith.constant 0 : index
      %9 = vector.load %arg5[%c0_6, %c0_7] : memref<128x128xf32, #tpu.memory_space<vmem>>, vector<128x128xf32>
      %10 = arith.addf %9, %2 : vector<128x128xf32>
      %c0_8 = arith.constant 0 : index
      %c0_9 = arith.constant 0 : index
      %11 = vector.load %arg5[%c0_8, %c0_9] : memref<128x128xf32, #tpu.memory_space<vmem>>, vector<128x128xf32>
      tpu.vector_store %arg5[%c0_8, %c0_9], %10 {strides = array<i32>} : memref<128x128xf32, #tpu.memory_space<vmem>>, vector<128x128xf32>,
    } else {
    }
    return
  }
  func.func @transform_0(%arg0: i32, %arg1: i32) -> (i32, i32) {
    %c0_i32 = arith.constant 0 : i32
    return %arg0, %arg1 : i32, i32
  }
  func.func @transform_1(%arg0: i32, %arg1: i32) -> (i32, i32) {
    %c0_i32 = arith.constant 0 : i32
    %c0_i32_0 = arith.constant 0 : i32
    return %arg1, %c0_i32 : i32, i32
  }
  func.func @transform_2(%arg0: i32, %arg1: i32) -> (i32, i32) {
    %c0_i32 = arith.constant 0 : i32
    %c0_i32_0 = arith.constant 0 : i32
    return %arg0, %c0_i32 : i32, i32
  }
  func.func @transform_3(%arg0: i32, %arg1: i32) -> (i32, i32) {
    %c0_i32 = arith.constant 0 : i32
    %c0_i32_0 = arith.constant 0 : i32
    return %arg0, %c0_i32 : i32, i32
  }
}

</mosaic_0001>

<bundles_post_ra>
// kernel: gcn_forward.1
= control target key start
LH: loop header
LB: loop body
LE: loop exit
PB: predicated region body
PF: predicated region fallthrough
CT: control target
= control target key end

     0   :  { %8 = vsyncpa [#allocation3], 0  ;;  %s623_s0 = inlined_call_operand.hbm [shape: bf16[128,128], index: 0, kind: input, shape index: {}]   ;;  %s624_s1 = inlined_call_operand.hbm [shape: bf16[128,128], index: 1, kind: input, shape index: {}]   ;;  %s625_s2 = inlined_call_operand.hbm [shape: f32[128,128], index: 2, kind: input, shape index: {}]   ;;  %s626_s3 = inlined_call_operand.hbm [shape: f32[128,128], index: 3, kind: output, shape index: {}]  }
   0x1   :  { %9 = vsyncpa [#allocation6], 0 }
   0x2   :  { %10 = vsyncpa [#allocation4], 0  ;;  %s28_s14 = sshll.u32 %s624_s1, 4  ;;  %s577_s15 = smov [#allocation5]   ;;  %s29_s14 = int_to_ptr.hbm [resolvable:$true] %s28_s14 }
   0x3   :  { %s30_s16 = sshll.u32 %s577_s15, 4  ;;  %s15_s19 = sshll.u32 %s623_s0, 4  ;;  %s31_s16 = int_to_ptr.vmem [resolvable:$true] %s30_s16  ;;  %s16_s19 = int_to_ptr.hbm [resolvable:$true] %s15_s19 }
   0x4   :  { %s578_s20 = smov 64   ;;  %s579_s21 = smov 4  }
   0x5   :  { %36 = dma.hbm_to_vmem [thread:$0]  %s29_s14, 1024, %s31_s16, [#allocation6], %s578_s20, %s578_s20, %s579_s21  }
   0x6   :  { %s580_s22 = smov [#allocation2]   ;;  %s41_s26 = sshll.u32 %s625_s2, 4  ;;  %s42_s26 = int_to_ptr.hbm [resolvable:$true] %s41_s26 }
   0x7   :  { %s17_s23 = sshll.u32 %s580_s22, 4  ;;  %s581_s1 = smov [#allocation7]   ;;  %s18_s23 = int_to_ptr.vmem [resolvable:$true] %s17_s23 }
   0x8   :  { %23 = dma.hbm_to_vmem [thread:$0]  %s16_s19, 1024, %s18_s23, [#allocation3], %s578_s20, %s578_s20, %s579_s21  }
   0x9   :  { %s43_s27 = sshll.u32 %s581_s1, 4  ;;  %s582_s28 = smov 128   ;;  %s44_s27 = int_to_ptr.vmem [resolvable:$true] %s43_s27 }
   0xa   :  { %s583_s29 = smov 8  }
   0xb   :  { %49 = dma.hbm_to_vmem [thread:$0]  %s42_s26, 2048, %s44_s27, [#allocation6], %s582_s28, %s582_s28, %s583_s29  }
   0xc   :  { %571 = dma.done.wait [#allocation3], 1024  }
   0xd   :  { %572 = vsyncadd [#allocation3], 4294966272 }
   0xe   :  { %573 = dma.done.wait [#allocation6], 3072  }
   0xf   :  { %574 = vsyncadd [#allocation6], 4294964224  ;;  %v442_v0 = vld [vmem:[#allocation5 + $0x38] sm:$0xff]  ;;  %v441_v1 = vld [vmem:[#allocation5 + $0x30] sm:$0xff]  ;;  %s584_s0 = smov [#allocation8]   ;;  %s349_s5 = sshll.u32 %s626_s3, 4  ;;  %s350_s5 = int_to_ptr.hbm [resolvable:$true] %s349_s5 }
  0x10   :  { %190 = vmatpush.bf16.msra.mxu0 %v442_v0  ;;  %443 = vmatpush.bf16.msra.mxu1 %v442_v0  ;;  %v440_v2 = vld [vmem:[#allocation5 + $0x28] sm:$0xff]  ;;  %v439_v3 = vld [vmem:[#allocation5 + $0x20] sm:$0xff]  ;;  %v438_v4 = vld [vmem:[#allocation5 + $0x18] sm:$0xff]  ;;  %s347_s2 = sshll.u32 %s584_s0, 4  ;;  %s348_s2 = int_to_ptr.vmem [resolvable:$true] %s347_s2 }
  0x11   :  { %444 = vmatpush.bf16.msra.mxu2 %v442_v0  ;;  %445 = vmatpush.bf16.msra.mxu3 %v442_v0  ;;  %v437_v5 = vld [vmem:[#allocation5 + $0x10] sm:$0xff]  ;;  %v436_v6 = vld [vmem:[#allocation5 + $0x8] sm:$0xff]  ;;  %v435_v7 = vld [vmem:[#allocation5] sm:$0xff] }
  0x12   :  { %v427_v8 = vld [vmem:[#allocation2] sm:$0xff]  ;;  %v429_v9 = vld [vmem:[#allocation2 + $0x10] sm:$0xff]  ;;  %v428_v12 = vld [vmem:[#allocation2 + $0x8] sm:$0xff] }
  0x13   :  { %v431_v10 = vld [vmem:[#allocation2 + $0x20] sm:$0xff]  ;;  %v433_v11 = vld [vmem:[#allocation2 + $0x30] sm:$0xff]  ;;  %v430_v13 = vld [vmem:[#allocation2 + $0x18] sm:$0xff] }
  0x14   :  { %191 = vmatpush.bf16.msra.mxu0 %v441_v1  ;;  %446 = vmatpush.bf16.msra.mxu1 %v441_v1  ;;  %v432_v14 = vld [vmem:[#allocation2 + $0x28] sm:$0xff]  ;;  %v434_v15 = vld [vmem:[#allocation2 + $0x38] sm:$0xff]  ;;  %v243_v16 = vld [vmem:[#allocation7] sm:$0xff] }
  0x15   :  { %447 = vmatpush.bf16.msra.mxu2 %v441_v1  ;;  %448 = vmatpush.bf16.msra.mxu3 %v441_v1  ;;  %v247_v17 = vld [vmem:[#allocation7 + $0x20] sm:$0xff]  ;;  %v244_v24 = vld [vmem:[#allocation7 + $0x8] sm:$0xff]  ;;  %v245_v36 = vld [vmem:[#allocation7 + $0x10] sm:$0xff] }
  0x16   :  { %v251_v22 = vld [vmem:[#allocation7 + $0x40] sm:$0xff]  ;;  %v248_v25 = vld [vmem:[#allocation7 + $0x28] sm:$0xff]  ;;  %v249_v37 = vld [vmem:[#allocation7 + $0x30] sm:$0xff] }
  0x17   :  { %v255_v23 = vld [vmem:[#allocation7 + $0x60] sm:$0xff]  ;;  %v252_v34 = vld [vmem:[#allocation7 + $0x48] sm:$0xff]  ;;  %v253_v46 = vld [vmem:[#allocation7 + $0x50] sm:$0xff] }
  0x18   :  { %192 = vmatpush.bf16.msra.mxu0 %v440_v2  ;;  %449 = vmatpush.bf16.msra.mxu1 %v440_v2  ;;  %v256_v35 = vld [vmem:[#allocation7 + $0x68] sm:$0xff]  ;;  %v257_v47 = vld [vmem:[#allocation7 + $0x70] sm:$0xff]  ;;  %v246_v48 = vld [vmem:[#allocation7 + $0x18] sm:$0xff] }
  0x19   :  { %450 = vmatpush.bf16.msra.mxu2 %v440_v2  ;;  %451 = vmatpush.bf16.msra.mxu3 %v440_v2  ;;  %v250_v49 = vld [vmem:[#allocation7 + $0x38] sm:$0xff] }
  0x1a   :  { %v254_v58 = vld [vmem:[#allocation7 + $0x58] sm:$0xff] }
  0x1b   :  { %v258_v59 = vld [vmem:[#allocation7 + $0x78] sm:$0xff] }
  0x1c   :  { %193 = vmatpush.bf16.msra.mxu0 %v439_v3  ;;  %452 = vmatpush.bf16.msra.mxu1 %v439_v3 }
  0x1d   :  { %453 = vmatpush.bf16.msra.mxu2 %v439_v3  ;;  %454 = vmatpush.bf16.msra.mxu3 %v439_v3 }
  0x20   :  { %194 = vmatpush.bf16.msra.mxu0 %v438_v4  ;;  %455 = vmatpush.bf16.msra.mxu1 %v438_v4 }
  0x21   :  { %456 = vmatpush.bf16.msra.mxu2 %v438_v4  ;;  %457 = vmatpush.bf16.msra.mxu3 %v438_v4 }
  0x24   :  { %195 = vmatpush.bf16.msra.mxu0 %v437_v5  ;;  %458 = vmatpush.bf16.msra.mxu1 %v437_v5 }
  0x25   :  { %459 = vmatpush.bf16.msra.mxu2 %v437_v5  ;;  %460 = vmatpush.bf16.msra.mxu3 %v437_v5 }
  0x28   :  { %196 = vmatpush.bf16.msra.mxu0 %v436_v6  ;;  %461 = vmatpush.bf16.msra.mxu1 %v436_v6 }
  0x29   :  { %462 = vmatpush.bf16.msra.mxu2 %v436_v6  ;;  %463 = vmatpush.bf16.msra.mxu3 %v436_v6 }
  0x2c   :  { %197 = vmatpush.bf16.msra.mxu0 %v435_v7  ;;  %464 = vmatpush.bf16.msra.mxu1 %v435_v7 }
  0x2d   :  { %465 = vmatpush.bf16.msra.mxu2 %v435_v7  ;;  %466 = vmatpush.bf16.msra.mxu3 %v435_v7 }
  0x2f   :  { %198 = vmatmul.bf16.vlgmr.msra.gmra.mxu0 %v427_v8  ;;  %208 = vmatmul.bf16.vlgmr.msra.gmra.mxu1 %v429_v9 }
  0x30   :  { %218 = vmatmul.bf16.vlgmr.msra.gmra.mxu2 %v431_v10  ;;  %228 = vmatmul.bf16.vlgmr.msra.gmra.mxu3 %v433_v11 }
  0x3f   :  { %203 = vmatmul.bf16.gmra.mxu0 %v428_v12  ;;  %213 = vmatmul.bf16.gmra.mxu1 %v430_v13 }
  0x40   :  { %223 = vmatmul.bf16.gmra.mxu2 %v432_v14  ;;  %233 = vmatmul.bf16.gmra.mxu3 %v434_v15 }
  0xac   :  { %v199_v18 = vpop.f32.mrf.mxu0  ;;  %v209_v19 = vpop.f32.mrf.mxu1 }
  0xad   :  { %v259_v20 = vadd.f32 %v243_v16, %v199_v18  ;;  %v263_v21 = vadd.f32 %v247_v17, %v209_v19 }
  0xaf   :  { %275 = vst [vmem:[#allocation8] sm:$0xff] %v259_v20 }
  0xb0   :  { %279 = vst [vmem:[#allocation8 + $0x20] sm:$0xff] %v263_v21 }
  0xb3   :  { %v219_v26 = vpop.f32.mrf.mxu2  ;;  %v229_v27 = vpop.f32.mrf.mxu3 }
  0xb4   :  { %v267_v28 = vadd.f32 %v251_v22, %v219_v26  ;;  %v271_v29 = vadd.f32 %v255_v23, %v229_v27  ;;  %v201_v30 = vpop.f32.mrf.mxu0  ;;  %v211_v31 = vpop.f32.mrf.mxu1 }
  0xb5   :  { %v260_v32 = vadd.f32 %v244_v24, %v201_v30  ;;  %v264_v33 = vadd.f32 %v248_v25, %v211_v31 }
  0xb6   :  { %283 = vst [vmem:[#allocation8 + $0x40] sm:$0xff] %v267_v28 }
  0xb7   :  { %287 = vst [vmem:[#allocation8 + $0x60] sm:$0xff] %v271_v29 }
  0xb8   :  { %276 = vst [vmem:[#allocation8 + $0x8] sm:$0xff] %v260_v32 }
  0xb9   :  { %280 = vst [vmem:[#allocation8 + $0x28] sm:$0xff] %v264_v33 }
  0xbb   :  { %v221_v38 = vpop.f32.mrf.mxu2  ;;  %v231_v39 = vpop.f32.mrf.mxu3 }
  0xbc   :  { %v268_v40 = vadd.f32 %v252_v34, %v221_v38  ;;  %v272_v41 = vadd.f32 %v256_v35, %v231_v39  ;;  %v204_v42 = vpop.f32.mrf.mxu0  ;;  %v214_v43 = vpop.f32.mrf.mxu1 }
  0xbd   :  { %v261_v44 = vadd.f32 %v245_v36, %v204_v42  ;;  %v265_v45 = vadd.f32 %v249_v37, %v214_v43 }
  0xbe   :  { %284 = vst [vmem:[#allocation8 + $0x48] sm:$0xff] %v268_v40 }
  0xbf   :  { %288 = vst [vmem:[#allocation8 + $0x68] sm:$0xff] %v272_v41 }
  0xc0   :  { %277 = vst [vmem:[#allocation8 + $0x10] sm:$0xff] %v261_v44 }
  0xc1   :  { %281 = vst [vmem:[#allocation8 + $0x30] sm:$0xff] %v265_v45 }
  0xc3   :  { %v224_v50 = vpop.f32.mrf.mxu2  ;;  %v234_v51 = vpop.f32.mrf.mxu3 }
  0xc4   :  { %v269_v52 = vadd.f32 %v253_v46, %v224_v50  ;;  %v273_v53 = vadd.f32 %v257_v47, %v234_v51  ;;  %v206_v54 = vpop.f32.mrf.mxu0  ;;  %v216_v55 = vpop.f32.mrf.mxu1 }
  0xc5   :  { %v262_v56 = vadd.f32 %v246_v48, %v206_v54  ;;  %v266_v57 = vadd.f32 %v250_v49, %v216_v55 }
  0xc6   :  { %285 = vst [vmem:[#allocation8 + $0x50] sm:$0xff] %v269_v52 }
  0xc7   :  { %289 = vst [vmem:[#allocation8 + $0x70] sm:$0xff] %v273_v53 }
  0xc8   :  { %278 = vst [vmem:[#allocation8 + $0x18] sm:$0xff] %v262_v56 }
  0xc9   :  { %282 = vst [vmem:[#allocation8 + $0x38] sm:$0xff] %v266_v57 }
  0xcb   :  { %v226_v60 = vpop.f32.mrf.mxu2  ;;  %v236_v61 = vpop.f32.mrf.mxu3 }
  0xcc   :  { %v270_v62 = vadd.f32 %v254_v58, %v226_v60  ;;  %v274_v63 = vadd.f32 %v258_v59, %v236_v61 }
  0xce   :  { %286 = vst [vmem:[#allocation8 + $0x58] sm:$0xff] %v270_v62 }
  0xcf   :  { %290 = vst [vmem:[#allocation8 + $0x78] sm:$0xff] %v274_v63 }
  0xd0   :  { %355 = dma.vmem_to_hbm [thread:$0]  %s348_s2, 2048, %s350_s5, [#allocation4], %s582_s28, %s582_s28, %s583_s29  }
  0xd1   :  { %575 = dma.done.wait [#allocation4], 2048  }
  0xd2   :  { %576 = vsyncadd [#allocation4], 4294965248 }
  0xd3   :  { %360 = vsyncpa [#allocation3], 1 }
  0xd4   :  { %361 = vsyncpa [#allocation6], 1 }
  0xd5   :  { %362 = vsyncpa [#allocation4], 1 }

</bundles_post_ra>
